<compile_context>
chip_gen: v7x
topology: tpu7x:2x2x1
jax: 0.10.0
libtpu: 0.0.40
codegen_flags: <defaults>
</compile_context>

<pallas_src>
import functools

import jax
import jax.numpy as jnp
from jax.experimental import pallas as pl
from jax.experimental.pallas import tpu as pltpu


def _cdiv(a, b):
    return (a + b - 1) // b


def _round_up(x, m):
    return ((x + m - 1) // m) * m


def mlp_kernel(x_ref,
               w1_ref, b1_ref,
               w2_ref, b2_ref,
               w3_ref, b3_ref,
               w4_ref, b4_ref,
               o_ref):
    """Fused 4-layer MLP forward on one (TB, in_features) activation tile.

    x tile is f32 (cast to bf16 in-kernel — free VPU filler under DMA slack);
    weights are bf16; matmuls accumulate in f32 on the MXU; bias add, ReLU and
    sigmoid stay in f32.
    """
    x = x_ref[...].astype(jnp.bfloat16)

    # fc1 + relu
    h = jnp.dot(x, w1_ref[...], preferred_element_type=jnp.float32) + b1_ref[...]
    h = jnp.maximum(h, 0.0)

    # fc2 + relu
    h = jnp.dot(h.astype(jnp.bfloat16), w2_ref[...],
                preferred_element_type=jnp.float32) + b2_ref[...]
    h = jnp.maximum(h, 0.0)

    # fc3 + relu
    h = jnp.dot(h.astype(jnp.bfloat16), w3_ref[...],
                preferred_element_type=jnp.float32) + b3_ref[...]
    h = jnp.maximum(h, 0.0)

    # fc4 + sigmoid
    h = jnp.dot(h.astype(jnp.bfloat16), w4_ref[...],
                preferred_element_type=jnp.float32) + b4_ref[...]
    h = jax.nn.sigmoid(h)

    o_ref[...] = h.astype(o_ref.dtype)


def _choose_tb(batch, tb_max):
    """Pick a batch tile: <= tb_max rows, multiple of 8 sublanes, at least two
    tiles when the batch allows it (so v7x's two TensorCores both get work),
    and balanced so the ragged last tile wastes as little as possible."""
    n_tiles = _cdiv(batch, tb_max)
    if batch >= 16:
        n_tiles = max(n_tiles, 2)
    n_tiles = max(n_tiles, 1)
    return _round_up(_cdiv(batch, n_tiles), 8)


@functools.partial(jax.jit, static_argnames=("tb",))
def mlp_forward(x, kparams, tb=1024):
    """Run the fused MLP kernel.

    x: (B, input_features) float32 array (cast to bf16 inside the kernel)
    kparams: dict with w1..w4 (in, out) bf16 and b1..b4 (1, out) f32.
    Returns (B, output_features) float32.
    """
    B, in_feat = x.shape
    out_feat = kparams["w4"].shape[1]

    TB = _choose_tb(B, tb)
    grid = (_cdiv(B, TB),)

    def const_spec(arr):
        # full array, DMA'd once, resident across all batch tiles
        return pl.BlockSpec(arr.shape, lambda i: (0,) * arr.ndim)

    operands = (
        x,
        kparams["w1"], kparams["b1"],
        kparams["w2"], kparams["b2"],
        kparams["w3"], kparams["b3"],
        kparams["w4"], kparams["b4"],
    )

    # x is the only streamed operand (double-buffered by default).
    # TODO(synk): if xprof shows exposed input DMA at very large batch, add
    # pipeline_mode=pl.Buffered(3) on this spec only.
    in_specs = [pl.BlockSpec((TB, in_feat), lambda i: (i, 0))] + \
               [const_spec(a) for a in operands[1:]]
    out_specs = pl.BlockSpec((TB, out_feat), lambda i: (i, 0))

    # Advisory cost estimate: tiny, memory-bound custom call.
    layer_dims = [kparams[f"w{i}"].shape for i in range(1, 5)]
    flops = 2 * B * sum(d_in * d_out for d_in, d_out in layer_dims)
    param_bytes = sum(int(v.size) * v.dtype.itemsize for v in kparams.values())
    bytes_accessed = (B * in_feat * x.dtype.itemsize      # input read
                      + param_bytes                        # weights/biases
                      + B * out_feat * 4)                  # f32 output write

    out = pl.pallas_call(
        mlp_kernel,
        out_shape=jax.ShapeDtypeStruct((B, out_feat), jnp.float32),
        grid=grid,
        in_specs=in_specs,
        out_specs=out_specs,
        compiler_params=pltpu.CompilerParams(
            dimension_semantics=("parallel",)),
        cost_estimate=pl.CostEstimate(
            flops=flops,
            transcendentals=B * out_feat,
            bytes_accessed=bytes_accessed),
    )(*operands)

    return out


def init_params(key, input_features, L1, L2, L3, output_features):
    """Deterministic f32 params mimicking nn.Linear init (uniform +-1/sqrt(fan_in)).

    Weights are stored transposed relative to PyTorch: (in, out)."""
    dims = [(input_features, L1), (L1, L2), (L2, L3), (L3, output_features)]
    params = {}
    for i, (fan_in, fan_out) in enumerate(dims, start=1):
        key, kw, kb = jax.random.split(key, 3)
        bound = 1.0 / jnp.sqrt(fan_in)
        params[f"w{i}"] = jax.random.uniform(
            kw, (fan_in, fan_out), jnp.float32, -bound, bound)
        params[f"b{i}"] = jax.random.uniform(
            kb, (1, fan_out), jnp.float32, -bound, bound)
    return params


def prepare_kernel_params(params):
    """bf16 weights (MXU path, half the DMA bytes), f32 biases. No padding."""
    kp = {}
    for i in range(1, 5):
        kp[f"w{i}"] = params[f"w{i}"].astype(jnp.bfloat16)
        kp[f"b{i}"] = params[f"b{i}"].astype(jnp.float32)
    return kp


def mlp_reference_bf16(x, kp):
    """Pure-JAX reference following the same bf16-input / f32-accumulate path."""
    h = jnp.dot(x.astype(jnp.bfloat16), kp["w1"],
                preferred_element_type=jnp.float32) + kp["b1"]
    h = jnp.maximum(h, 0.0)
    h = jnp.dot(h.astype(jnp.bfloat16), kp["w2"],
                preferred_element_type=jnp.float32) + kp["b2"]
    h = jnp.maximum(h, 0.0)
    h = jnp.dot(h.astype(jnp.bfloat16), kp["w3"],
                preferred_element_type=jnp.float32) + kp["b3"]
    h = jnp.maximum(h, 0.0)
    h = jnp.dot(h.astype(jnp.bfloat16), kp["w4"],
                preferred_element_type=jnp.float32) + kp["b4"]
    return jax.nn.sigmoid(h)


def mlp_reference_f32(x, params):
    """Full-precision reference (for a loose sanity check only)."""
    h = jnp.maximum(x @ params["w1"] + params["b1"], 0.0)
    h = jnp.maximum(h @ params["w2"] + params["b2"], 0.0)
    h = jnp.maximum(h @ params["w3"] + params["b3"], 0.0)
    return jax.nn.sigmoid(h @ params["w4"] + params["b4"])


if __name__ == "__main__":
    # Small shapes consistent with the module's forward pass.
    input_features, L1, L2, L3, output_features = 32, 64, 64, 32, 16

    key = jax.random.PRNGKey(0)
    key, kx1, kx2 = jax.random.split(key, 3)

    params = init_params(key, input_features, L1, L2, L3, output_features)
    kparams = prepare_kernel_params(params)

    # --- small batch (single grid step) ---
    batch = 8
    x = jax.random.normal(kx1, (batch, input_features), jnp.float32)

    out = jax.block_until_ready(mlp_forward(x, kparams))
    ref = mlp_reference_bf16(x, kparams)
    ref32 = mlp_reference_f32(x, params)

    assert out.shape == (batch, output_features)
    assert jnp.allclose(out, ref, atol=1e-3, rtol=1e-3), "mismatch vs bf16 reference"
    assert jnp.allclose(out, ref32, atol=3e-2, rtol=3e-2), "mismatch vs f32 reference"

    # --- larger, non-multiple batch (exercises multi-step grid + ragged edge) ---
    batch2 = 300
    x2 = jax.random.normal(kx2, (batch2, input_features), jnp.float32)

    out2 = jax.block_until_ready(mlp_forward(x2, kparams))
    ref2 = mlp_reference_bf16(x2, kparams)

    assert out2.shape == (batch2, output_features)
    assert jnp.allclose(out2, ref2, atol=1e-3, rtol=1e-3), "mismatch (batch=300)"

    print("KERNEL_OK")
</pallas_src>

<mosaic_0001>
module attributes {stable_mosaic.version = 11 : i64} {
  func.func @mlp_kernel(%arg0: i32, %arg1: memref<8x32xf32, #tpu.memory_space<vmem>>, %arg2: memref<32x64xbf16, #tpu.memory_space<vmem>>, %arg3: memref<1x64xf32, #tpu.memory_space<vmem>>, %arg4: memref<64x64xbf16, #tpu.memory_space<vmem>>, %arg5: memref<1x64xf32, #tpu.memory_space<vmem>>, %arg6: memref<64x32xbf16, #tpu.memory_space<vmem>>, %arg7: memref<1x32xf32, #tpu.memory_space<vmem>>, %arg8: memref<32x16xbf16, #tpu.memory_space<vmem>>, %arg9: memref<1x16xf32, #tpu.memory_space<vmem>>, %arg10: memref<8x16xf32, #tpu.memory_space<vmem>>) attributes {dimension_semantics = [#tpu.dimension_semantics<parallel>], iteration_bounds = array<i64: 1>, scalar_prefetch = 0 : i64, scratch_operands = 0 : i64, tpu.core_type = #tpu.core_type<tc>, window_params = [{transform_indices = @transform_0, window_bounds = array<i64: 8, 32>}, {pipeline_mode = #tpu.pipeline_mode<synchronous>, transform_indices = @transform_1, window_bounds = array<i64: 32, 64>}, {pipeline_mode = #tpu.pipeline_mode<synchronous>, transform_indices = @transform_2, window_bounds = array<i64: 1, 64>}, {pipeline_mode = #tpu.pipeline_mode<synchronous>, transform_indices = @transform_3, window_bounds = array<i64: 64, 64>}, {pipeline_mode = #tpu.pipeline_mode<synchronous>, transform_indices = @transform_4, window_bounds = array<i64: 1, 64>}, {pipeline_mode = #tpu.pipeline_mode<synchronous>, transform_indices = @transform_5, window_bounds = array<i64: 64, 32>}, {pipeline_mode = #tpu.pipeline_mode<synchronous>, transform_indices = @transform_6, window_bounds = array<i64: 1, 32>}, {pipeline_mode = #tpu.pipeline_mode<synchronous>, transform_indices = @transform_7, window_bounds = array<i64: 32, 16>}, {pipeline_mode = #tpu.pipeline_mode<synchronous>, transform_indices = @transform_8, window_bounds = array<i64: 1, 16>}, {transform_indices = @transform_9, window_bounds = array<i64: 8, 16>}]} {
    %c0 = arith.constant 0 : index
    %c0_0 = arith.constant 0 : index
    %0 = vector.load %arg1[%c0, %c0_0] : memref<8x32xf32, #tpu.memory_space<vmem>>, vector<8x32xf32>
    %1 = arith.truncf %0 : vector<8x32xf32> to vector<8x32xbf16>
    %c0_1 = arith.constant 0 : index
    %c0_2 = arith.constant 0 : index
    %2 = vector.load %arg2[%c0_1, %c0_2] : memref<32x64xbf16, #tpu.memory_space<vmem>>, vector<32x64xbf16>
    %cst = arith.constant dense<0.000000e+00> : vector<8x64xf32>
    %3 = tpu.matmul %1, %2, %cst {dimension_numbers = #tpu.dot_dimension_numbers<[1], [0], [0], [1], [0, 0, 1, 1], [], []>} : vector<8x32xbf16>, vector<32x64xbf16>, vector<8x64xf32> -> vector<8x64xf32>
    %c0_3 = arith.constant 0 : index
    %c0_4 = arith.constant 0 : index
    %4 = vector.load %arg3[%c0_3, %c0_4] : memref<1x64xf32, #tpu.memory_space<vmem>>, vector<1x64xf32>
    %5 = vector.broadcast %4 : vector<1x64xf32> to vector<8x64xf32>
    %6 = arith.addf %3, %5 : vector<8x64xf32>
    %cst_5 = arith.constant 0.000000e+00 : f32
    %7 = vector.broadcast %cst_5 : f32 to vector<8x64xf32>
    %8 = arith.maximumf %6, %7 : vector<8x64xf32>
    %9 = arith.truncf %8 : vector<8x64xf32> to vector<8x64xbf16>
    %c0_6 = arith.constant 0 : index
    %c0_7 = arith.constant 0 : index
    %10 = vector.load %arg4[%c0_6, %c0_7] : memref<64x64xbf16, #tpu.memory_space<vmem>>, vector<64x64xbf16>
    %cst_8 = arith.constant dense<0.000000e+00> : vector<8x64xf32>
    %11 = tpu.matmul %9, %10, %cst_8 {dimension_numbers = #tpu.dot_dimension_numbers<[1], [0], [0], [1], [0, 0, 1, 1], [], []>} : vector<8x64xbf16>, vector<64x64xbf16>, vector<8x64xf32> -> vector<8x64xf32>
    %c0_9 = arith.constant 0 : index
    %c0_10 = arith.constant 0 : index
    %12 = vector.load %arg5[%c0_9, %c0_10] : memref<1x64xf32, #tpu.memory_space<vmem>>, vector<1x64xf32>
    %13 = vector.broadcast %12 : vector<1x64xf32> to vector<8x64xf32>
    %14 = arith.addf %11, %13 : vector<8x64xf32>
    %cst_11 = arith.constant 0.000000e+00 : f32
    %15 = vector.broadcast %cst_11 : f32 to vector<8x64xf32>
    %16 = arith.maximumf %14, %15 : vector<8x64xf32>
    %17 = arith.truncf %16 : vector<8x64xf32> to vector<8x64xbf16>
    %c0_12 = arith.constant 0 : index
    %c0_13 = arith.constant 0 : index
    %18 = vector.load %arg6[%c0_12, %c0_13] : memref<64x32xbf16, #tpu.memory_space<vmem>>, vector<64x32xbf16>
    %cst_14 = arith.constant dense<0.000000e+00> : vector<8x32xf32>
    %19 = tpu.matmul %17, %18, %cst_14 {dimension_numbers = #tpu.dot_dimension_numbers<[1], [0], [0], [1], [0, 0, 1, 1], [], []>} : vector<8x64xbf16>, vector<64x32xbf16>, vector<8x32xf32> -> vector<8x32xf32>
    %c0_15 = arith.constant 0 : index
    %c0_16 = arith.constant 0 : index
    %20 = vector.load %arg7[%c0_15, %c0_16] : memref<1x32xf32, #tpu.memory_space<vmem>>, vector<1x32xf32>
    %21 = vector.broadcast %20 : vector<1x32xf32> to vector<8x32xf32>
    %22 = arith.addf %19, %21 : vector<8x32xf32>
    %cst_17 = arith.constant 0.000000e+00 : f32
    %23 = vector.broadcast %cst_17 : f32 to vector<8x32xf32>
    %24 = arith.maximumf %22, %23 : vector<8x32xf32>
    %25 = arith.truncf %24 : vector<8x32xf32> to vector<8x32xbf16>
    %c0_18 = arith.constant 0 : index
    %c0_19 = arith.constant 0 : index
    %26 = vector.load %arg8[%c0_18, %c0_19] : memref<32x16xbf16, #tpu.memory_space<vmem>>, vector<32x16xbf16>
    %cst_20 = arith.constant dense<0.000000e+00> : vector<8x16xf32>
    %27 = tpu.matmul %25, %26, %cst_20 {dimension_numbers = #tpu.dot_dimension_numbers<[1], [0], [0], [1], [0, 0, 1, 1], [], []>} : vector<8x32xbf16>, vector<32x16xbf16>, vector<8x16xf32> -> vector<8x16xf32>
    %c0_21 = arith.constant 0 : index
    %c0_22 = arith.constant 0 : index
    %28 = vector.load %arg9[%c0_21, %c0_22] : memref<1x16xf32, #tpu.memory_space<vmem>>, vector<1x16xf32>
    %29 = vector.broadcast %28 : vector<1x16xf32> to vector<8x16xf32>
    %30 = arith.addf %27, %29 : vector<8x16xf32>
    %31 = arith.negf %30 : vector<8x16xf32>
    %32 = math.exp %31 : vector<8x16xf32>
    %cst_23 = arith.constant 1.000000e+00 : f32
    %33 = vector.broadcast %cst_23 : f32 to vector<8x16xf32>
    %34 = arith.addf %33, %32 : vector<8x16xf32>
    %35 = arith.divf %33, %34 : vector<8x16xf32>
    %c0_24 = arith.constant 0 : index
    %c0_25 = arith.constant 0 : index
    %36 = vector.load %arg10[%c0_24, %c0_25] : memref<8x16xf32, #tpu.memory_space<vmem>>, vector<8x16xf32>
    tpu.vector_store %arg10[%c0_24, %c0_25], %35 {strides = array<i32>} : memref<8x16xf32, #tpu.memory_space<vmem>>, vector<8x16xf32>,
    return
  }
  func.func @transform_0(%arg0: i32) -> (i32, i32) {
    %c0_i32 = arith.constant 0 : i32
    %c0_i32_0 = arith.constant 0 : i32
    return %arg0, %c0_i32 : i32, i32
  }
  func.func @transform_1(%arg0: i32) -> (i32, i32) {
    %c0_i32 = arith.constant 0 : i32
    %c0_i32_0 = arith.constant 0 : i32
    %c0_i32_1 = arith.constant 0 : i32
    return %c0_i32, %c0_i32_0 : i32, i32
  }
  func.func @transform_2(%arg0: i32) -> (i32, i32) {
    %c0_i32 = arith.constant 0 : i32
    %c0_i32_0 = arith.constant 0 : i32
    %c0_i32_1 = arith.constant 0 : i32
    return %c0_i32, %c0_i32_0 : i32, i32
  }
  func.func @transform_3(%arg0: i32) -> (i32, i32) {
    %c0_i32 = arith.constant 0 : i32
    %c0_i32_0 = arith.constant 0 : i32
    %c0_i32_1 = arith.constant 0 : i32
    return %c0_i32, %c0_i32_0 : i32, i32
  }
  func.func @transform_4(%arg0: i32) -> (i32, i32) {
    %c0_i32 = arith.constant 0 : i32
    %c0_i32_0 = arith.constant 0 : i32
    %c0_i32_1 = arith.constant 0 : i32
    return %c0_i32, %c0_i32_0 : i32, i32
  }
  func.func @transform_5(%arg0: i32) -> (i32, i32) {
    %c0_i32 = arith.constant 0 : i32
    %c0_i32_0 = arith.constant 0 : i32
    %c0_i32_1 = arith.constant 0 : i32
    return %c0_i32, %c0_i32_0 : i32, i32
  }
  func.func @transform_6(%arg0: i32) -> (i32, i32) {
    %c0_i32 = arith.constant 0 : i32
    %c0_i32_0 = arith.constant 0 : i32
    %c0_i32_1 = arith.constant 0 : i32
    return %c0_i32, %c0_i32_0 : i32, i32
  }
  func.func @transform_7(%arg0: i32) -> (i32, i32) {
    %c0_i32 = arith.constant 0 : i32
    %c0_i32_0 = arith.constant 0 : i32
    %c0_i32_1 = arith.constant 0 : i32
    return %c0_i32, %c0_i32_0 : i32, i32
  }
  func.func @transform_8(%arg0: i32) -> (i32, i32) {
    %c0_i32 = arith.constant 0 : i32
    %c0_i32_0 = arith.constant 0 : i32
    %c0_i32_1 = arith.constant 0 : i32
    return %c0_i32, %c0_i32_0 : i32, i32
  }
  func.func @transform_9(%arg0: i32) -> (i32, i32) {
    %c0_i32 = arith.constant 0 : i32
    %c0_i32_0 = arith.constant 0 : i32
    return %arg0, %c0_i32 : i32, i32
  }
}

</mosaic_0001>

<bundles_post_ra>
// kernel: mlp_forward.1
= control target key start
LH: loop header
LB: loop body
LE: loop exit
PB: predicated region body
PF: predicated region fallthrough
CT: control target
= control target key end

     0   :  { %v482_v1 = vmov 0.0   ;;  %vm483_vm0 = vmmov 0   ;;  %vm59_vm1 = vcmask 261120   ;;  %s606_s0 = inlined_call_operand.vmem [shape: f32[8,32], index: 0, kind: input, shape index: {}]   ;;  %s607_s1 = inlined_call_operand.vmem [shape: bf16[32,64], index: 1, kind: input, shape index: {}]   ;;  %s608_s2 = inlined_call_operand.vmem [shape: f32[1,64], index: 2, kind: input, shape index: {}]   ;;  %s609_s3 = inlined_call_operand.vmem [shape: bf16[64,64], index: 3, kind: input, shape index: {}]   ;;  %s610_s4 = inlined_call_operand.vmem [shape: f32[1,64], index: 4, kind: input, shape index: {}]   ;;  %s611_s5 = inlined_call_operand.vmem [shape: bf16[64,32], index: 5, kind: input, shape index: {}]   ;;  %s612_s6 = inlined_call_operand.vmem [shape: f32[1,32], index: 6, kind: input, shape index: {}]   ;;  %s613_s7 = inlined_call_operand.vmem [shape: bf16[32,16], index: 7, kind: input, shape index: {}]   ;;  %s614_s8 = inlined_call_operand.vmem [shape: f32[1,16], index: 8, kind: input, shape index: {}]   ;;  %s615_s9 = inlined_call_operand.hbm [shape: f32[8,16], index: 9, kind: output, shape index: {}]  }
   0x1   :  { %v442_v0 = vld [vmem:[%s607_s1] sm:$0xff]   ;;  %399 = vmatprep.subr.bf16.mxu0 %v482_v1  ;;  %v443_v2 = vld [vmem:[%s607_s1 + $0x8] sm:$0xff]   ;;  %407 = vmatprep.subr.bf16.mxu1 %v482_v1 }
   0x2   :  { %400 = vmatpush3.bf16.msra.mxu0 %v442_v0  ;;  %403 = vmatprep.mubr.msk.bf16.mxu0 %vm483_vm0, %v482_v1  ;;  %v34_v3 = vld [vmem:[%s606_s0] sm:$0xff]  ;;  %v445_v5 = vld [vmem:[%s609_s3 + $0x8] sm:$0xff]  }
   0x3   :  { %401 = vmatprep.subr.bf16.mxu0 %v482_v1  ;;  %v444_v4 = vld [vmem:[%s609_s3] sm:$0xff]   ;;  %415 = vmatprep.mubr.msk.bf16.mxu1 %vm483_vm0, %v482_v1  ;;  %v35_v6 = vpack.c.bf16 %v34_v3, %v34_v3 }
   0x4   :  { %408 = vmatpush3.bf16.msra.mxu1 %v444_v4 }
   0x5   :  { %409 = vmatprep.subr.bf16.mxu1 %v482_v1 }
   0x6   :  { %402 = vmatpush3.bf16.msra.mxu0 %v443_v2 }
   0x7   :  { %419 = vmatprep.subr.bf16.mxu0 %v482_v1 }
   0x8   :  { %410 = vmatpush3.bf16.msra.mxu1 %v445_v5 }
   0x9   :  { %404 = vmatmul.mubr.msk.bf16.vlgmr.msra.gmra.mrb[0].mxu0 %vm59_vm1, %v35_v6  ;;  %411 = vmatprep.subr.bf16.mxu1 %v482_v1 }
   0xa   :  { %427 = vmatprep.mubr.msk.bf16.mxu0 %vm483_vm0, %v482_v1 }
   0xb   :  { %14 = vsyncpa [#allocation3], 0  ;;  %v446_v7 = vld [vmem:[%s609_s3 + $0x10] sm:$0xff]   ;;  %v447_v8 = vld [vmem:[%s609_s3 + $0x18] sm:$0xff]   ;;  %vm144_vm2 = vcmask 523264   ;;  %vm346_vm3 = vcmask 130048  }
   0xc   :  { %412 = vmatpush3.bf16.msra.mxu1 %v446_v7  ;;  %v448_v9 = vld [vmem:[%s611_s5] sm:$0xff]   ;;  %v449_v10 = vld [vmem:[%s611_s5 + $0x8] sm:$0xff]   ;;  %v450_v19 = vld [vmem:[%s611_s5 + $0x10] sm:$0xff]  }
   0xd   :  { %413 = vmatprep.subr.bf16.mxu1 %v482_v1  ;;  %420 = vmatpush3.bf16.msra.mxu0 %v448_v9  ;;  %v362_v11 = vld [vmem:[%s608_s2] ss:$0 sm:$0xff]  ;;  %v451_v20 = vld [vmem:[%s611_s5 + $0x18] sm:$0xff]   ;;  %v453_v30 = vld [vmem:[%s613_s7 + $0x8] sm:$0xff]  }
   0xe   :  { %421 = vmatprep.subr.bf16.mxu0 %v482_v1  ;;  %v452_v21 = vld [vmem:[%s613_s7] sm:$0xff]  }
   0xf   :  { %v366_v22 = vld [vmem:[%s610_s4] ss:$0 sm:$0xff] }
  0x10   :  { %414 = vmatpush3.bf16.msra.mxu1 %v447_v8  ;;  %v372_v31 = vld [vmem:[%s612_s6] ss:$0 sm:$0xff]  ;;  %s484_s6 = smov [#allocation2]  }
  0x11   :  { %431 = vmatprep.subr.bf16.mxu1 %v482_v1  ;;  %422 = vmatpush3.bf16.msra.mxu0 %v449_v10  ;;  %v378_v39 = vld [vmem:[%s614_s8] ss:$0 sm:$0xff]  ;;  %s354_s7 = sshll.u32 %s484_s6, 4  ;;  %s355_s7 = int_to_ptr.vmem [resolvable:$true] %s354_s7 }
  0x12   :  { %423 = vmatprep.subr.bf16.mxu0 %v482_v1  ;;  %s458_s16 = scalar_lea.vmem %s355_s7, 128  ;;  %p463_p1 = scmp.lt.s32.totalorder %s355_s7, %s355_s7 }
  0x13   :  { %p459_p0 = scmp.ne.s32.totalorder %s355_s7, %s458_s16  ;;  %p464_p2 = scmp.lt.s32.totalorder %s458_s16, %s458_s16 }
  0x15   :  { %424 = vmatpush3.bf16.msra.mxu0 %v450_v19  ;;  %p465_p3 = por %p464_p2, %p463_p1 }
  0x16   :  { %425 = vmatprep.subr.bf16.mxu0 %v482_v1 }
  0x17   :  { %p466_p4 = pnand %p465_p3, %p459_p0 }
  0x19   :  { %426 = vmatpush3.bf16.msra.mxu0 %v451_v20 }
  0xdc   :  { %v97_v12 = vpop.f32.mrb[0].mxu0 }
  0xdd   :  { %v98_v13 = vadd.f32 %v362_v11, %v97_v12  ;;  %v405_v14 = vpop.f32.mrb[1].mxu0 }
  0xde   :  { %v100_v15 = vpop.f32.mrb[2].mxu0 }
  0xdf   :  { %v103_v16 = vmax.f32 %v98_v13, 0.0  ;;  %v406_v17 = vpop.f32.mrb[3].mxu0 }
  0xe1   :  { %v104_v18 = vpack.c.bf16 %v103_v16, %v103_v16 }
  0xe3   :  { %416 = vmatmul.mubr.msk.bf16.vlgmr.msra.gmra.mrb[0].mxu1 %vm144_vm2, %v104_v18 }
  0xe4   :  { %435 = vmatprep.mubr.msk.bf16.mxu1 %vm483_vm0, %v482_v1  ;;  %432 = vmatpush3.bf16.msra.mxu1 %v452_v21 }
  0xe5   :  { %433 = vmatprep.subr.bf16.mxu1 %v482_v1 }
  0xe8   :  { %434 = vmatpush3.bf16.msra.mxu1 %v453_v30 }
 0x1b6   :  { %v182_v23 = vpop.f32.mrb[0].mxu1 }
 0x1b7   :  { %v183_v24 = vadd.f32 %v366_v22, %v182_v23  ;;  %v417_v25 = vpop.f32.mrb[1].mxu1 }
 0x1b8   :  { %v185_v26 = vpop.f32.mrb[2].mxu1 }
 0x1b9   :  { %v188_v27 = vmax.f32 %v183_v24, 0.0  ;;  %v418_v28 = vpop.f32.mrb[3].mxu1 }
 0x1bb   :  { %v189_v29 = vpack.c.bf16 %v188_v27, %v188_v27 }
 0x1bd   :  { %428 = vmatmul.mubr.msk.bf16.vlgmr.msra.gmra.mrb[4].mxu0 %vm144_vm2, %v189_v29 }
 0x290   :  { %v266_v32 = vpop.f32.mrb[4].mxu0 }
 0x291   :  { %v267_v33 = vadd.f32 %v372_v31, %v266_v32  ;;  %v429_v34 = vpop.f32.mrb[5].mxu0 }
 0x292   :  { %v269_v35 = vpop.f32.mrb[6].mxu0 }
 0x293   :  { %v272_v36 = vmax.f32 %v267_v33, 0.0  ;;  %v430_v37 = vpop.f32.mrb[7].mxu0 }
 0x295   :  { %v273_v38 = vpack.c.bf16 %v272_v36, %v272_v36 }
 0x297   :  { %436 = vmatmul.mubr.msk.bf16.vlgmr.msra.gmra.mrb[4].mxu1 %vm59_vm1, %v273_v38 }
 0x36a   :  { %v334_v40 = vpop.f32.mrb[4].mxu1 }
 0x36b   :  { %v335_v41 = vadd.f32 %v378_v39, %v334_v40  ;;  %v437_v42 = vpop.f32.mrb[5].mxu1 }
 0x36c   :  { %v337_v43 = vpop.f32.mrb[6].mxu1 }
 0x36d   :  { %v382_v44 = vmul.f32 -1.442695, %v335_v41  ;;  %v438_v45 = vpop.f32.mrb[7].mxu1 }
 0x36f   :  { %454 = vpow2.f32 %v382_v44 }
 0x379   :  { %v455_v46 = vpop.eup %454 }
 0x37a   :  { %v343_v47 = vadd.f32 1.0, %v455_v46 }
 0x37c   :  { %456 = vrcp.f32 %v343_v47 }
 0x386   :  { %v457_v48 = vpop.eup %456 }
 0x387   :  { %347 = vst.msk [vmem:[#allocation2] sm:$0xff] %vm346_vm3, %v457_v48 }
 0x388   :  { %469 = shalt.err (!%p466_p4)
}
 0x389   :  { %s470_s18 = scalar_lea.hbm %s615_s9, 128 }
 0x38a   :  { %p471_p5 = scmp.ne.s32.totalorder %s615_s9, %s470_s18  ;;  %p474_p6 = scmp.lt.u32.totalorder %s470_s18, %s615_s9 }
 0x38c   :  { %p476_p7 = pnand %p474_p6, %p471_p5 }
 0x38e   :  { %479 = shalt.err (!%p476_p7)
}
 0x38f   :  { %357 = dma.vmem_to_hbm [thread:$0]  %s355_s7, 128, %s615_s9, [#allocation3]  }
 0x390   :  { %480 = dma.done.wait [#allocation3], 128  }
 0x391   :  { %481 = vsyncadd [#allocation3], 4294967168 }
 0x392   :  { %361 = vsyncpa [#allocation3], 1 }

</bundles_post_ra>
